<compile_context>
chip_gen: v5e
topology: v5e:2x2
jax: 0.10.0
libtpu: 0.0.40
codegen_flags: <defaults>
</compile_context>

<pallas_src>
import functools

import jax
import jax.numpy as jnp
from jax.experimental import pallas as pl
from jax.experimental.pallas import tpu as pltpu


def _vmem_capacity_bytes():
    """Generation-aware VMEM capacity; falls back to the smallest (v7x, 64 MiB per core)."""
    try:
        info = pltpu.get_tpu_info()
        cap = getattr(info, "vmem_capacity_bytes", None)
        if cap:
            return int(cap)
    except Exception:
        pass
    return 64 * 1024 * 1024


def _ce_loss_kernel(x_ref, y_ref, wy_ref, out_ref, *, n_rows):
    """One batch tile of weighted cross-entropy; emits a per-tile partial sum.

    x_ref  : (TN, C)     logits (bf16 or f32; compute in f32)
    y_ref  : (TN, 1)     int32 class index
    wy_ref : (TN, 1)     f32 per-sample weight (weights[y], gathered in the wrapper)
    out_ref: (1, 1, 128) f32 partial sum for this tile (scalar broadcast across lanes)
    """
    i = pl.program_id(0)
    tn = x_ref.shape[0]

    x = x_ref[...].astype(jnp.float32)            # (TN, C) f32 compute on every TPU gen
    y = y_ref[...]                                # (TN, 1) i32
    wy = wy_ref[...]                              # (TN, 1) f32

    # log-sum-exp:  -log(softmax(x)[y]) == lse(x) - x[y]
    x_max = jnp.max(x, axis=1, keepdims=True)                                   # (TN, 1)
    lse = x_max + jnp.log(jnp.sum(jnp.exp(x - x_max), axis=1, keepdims=True))   # (TN, 1)

    # x[i, y_i] via a single select + lane reduce (no one-hot cast / extra multiplies).
    iota_c = jax.lax.broadcasted_iota(jnp.int32, x.shape, 1)                    # (TN, C)
    x_at_y = jnp.sum(jnp.where(iota_c == y, x, 0.0), axis=1, keepdims=True)     # (TN, 1)

    # Batch-tail mask: rows of a partial last block hold unspecified data -> force them to 0
    # (jnp.where selects, so NaN/Inf garbage in invalid rows never propagates).
    row = jax.lax.broadcasted_iota(jnp.int32, (tn, 1), 0)
    valid = (i * tn + row) < n_rows
    contrib = jnp.where(valid, wy * (lse - x_at_y), 0.0)                        # (TN, 1)

    out_ref[...] = jnp.full((1, 1, 128), jnp.sum(contrib))


def cross_entropy_loss(x, y, weights, *, tile_rows=None):
    """x: (N, C) float logits; y: (N,) int class indices; weights: (C,) float."""
    N, C = x.shape

    # Keep bf16 logits in bf16 over the DMA (kernel is HBM-bound at real sizes);
    # anything else goes to f32.  Compute is always f32 inside the kernel.
    if x.dtype not in (jnp.bfloat16, jnp.float32):
        x = x.astype(jnp.float32)
    itemsize = jnp.dtype(x.dtype).itemsize

    # Per-sample weights gathered once here (tiny XLA gather) so the kernel never touches
    # the (C,) class-weight row inside its hot (TN, C) loop.
    wy = weights.astype(jnp.float32)[y].reshape(N, 1)
    y2 = y.astype(jnp.int32).reshape(N, 1)

    # Generation-aware tile sizing: double-buffered logits pair <= ~24 MiB on v7x (64 MiB VMEM),
    # <= ~48 MiB on v5e/v6e (128 MiB VMEM).
    vmem_cap = _vmem_capacity_bytes()
    pair_budget = min(48 * 1024 * 1024, vmem_cap * 3 // 8)
    tile_bytes = pair_budget // 2
    if tile_rows is None:
        tn = tile_bytes // max(1, C * itemsize)
        tn = max(8, min(4096, (tn // 8) * 8))
    else:
        tn = int(tile_rows)
    if tn >= N:
        tn = N  # single tile; a full-dim block needs no (8,128) alignment
    # TODO(synk): for very large C (an (8, C) double-buffered pair no longer fits the VMEM
    # budget, e.g. LM vocab >= ~1M), add a class-axis grid dimension with an online
    # (running-max) logsumexp + running x_at_y instead of one (tn, C) slab.

    num_tiles = pl.cdiv(N, tn)

    cost = pl.CostEstimate(
        flops=6 * N * C,
        transcendentals=N * C + N,
        bytes_accessed=N * C * itemsize + N * 8 + num_tiles * 512,
    )

    partials = pl.pallas_call(
        functools.partial(_ce_loss_kernel, n_rows=N),
        out_shape=jax.ShapeDtypeStruct((num_tiles, 1, 128), jnp.float32),
        grid_spec=pltpu.PrefetchScalarGridSpec(
            num_scalar_prefetch=0,
            grid=(num_tiles,),
            in_specs=[
                pl.BlockSpec((tn, C), lambda i: (i, 0)),   # logits tile (unpadded HBM read)
                pl.BlockSpec((tn, 1), lambda i: (i, 0)),   # labels tile
                pl.BlockSpec((tn, 1), lambda i: (i, 0)),   # per-sample weights tile
            ],
            out_specs=pl.BlockSpec((1, 1, 128), lambda i: (i, 0, 0)),
        ),
        compiler_params=pltpu.CompilerParams(
            dimension_semantics=("parallel",),  # independent per-tile partials (2 TCs on v7x)
            vmem_limit_bytes=min(vmem_cap * 3 // 4, 64 * 1024 * 1024),
        ),
        cost_estimate=cost,
    )(x, y2, wy)

    # Plain mean over the ORIGINAL batch size (module uses .mean(), not weight-normalized).
    return jnp.sum(partials[:, 0, 0]) / N


def _reference(x, y, weights):
    eps = 1e-12
    sm = jax.nn.softmax(x.astype(jnp.float32), axis=1)
    nll = -jnp.log(sm + eps)
    per_sample = nll[jnp.arange(y.shape[0]), y]
    w = weights.astype(jnp.float32)[y]
    return jnp.mean(per_sample * w)


if __name__ == "__main__":
    key = jax.random.PRNGKey(0)

    def check(n, c, dtype, tile_rows=None, tol=1e-5):
        kx, ky = jax.random.split(jax.random.fold_in(key, n * 1000 + c))
        x = jax.random.normal(kx, (n, c), dtype=jnp.float32).astype(dtype)
        y = jax.random.randint(ky, (n,), 0, c, dtype=jnp.int32)
        weights = (jnp.arange(c, dtype=jnp.float32) + 1.0) / c  # deterministic class weights
        loss = cross_entropy_loss(x, y, weights, tile_rows=tile_rows)
        jax.block_until_ready(loss)
        ref = _reference(x.astype(jnp.float32), y, weights)
        assert jnp.allclose(loss, ref, rtol=tol, atol=tol), (n, c, str(dtype), loss, ref)

    check(8, 16, jnp.float32)                   # single full-dim block
    check(20, 16, jnp.float32, tile_rows=8)     # multi-tile grid + partial last block (row mask)
    check(12, 16, jnp.bfloat16)                 # bf16 logits kept bf16 over the DMA

    print("KERNEL_OK")
</pallas_src>

<mosaic_0001>
module attributes {stable_mosaic.version = 11 : i64} {
  func.func @_ce_loss_kernel(%arg0: i32, %arg1: memref<8x16xf32, #tpu.memory_space<vmem>>, %arg2: memref<8x1xi32, #tpu.memory_space<vmem>>, %arg3: memref<8x1xf32, #tpu.memory_space<vmem>>, %arg4: memref<1x1x128xf32, #tpu.memory_space<vmem>>) attributes {dimension_semantics = [#tpu.dimension_semantics<parallel>], iteration_bounds = array<i64: 1>, scalar_prefetch = 0 : i64, scratch_operands = 0 : i64, tpu.core_type = #tpu.core_type<tc>, window_params = [{transform_indices = @transform_0, window_bounds = array<i64: 8, 16>}, {transform_indices = @transform_1, window_bounds = array<i64: 8, 1>}, {transform_indices = @transform_2, window_bounds = array<i64: 8, 1>}, {transform_indices = @transform_3, window_bounds = array<i64: 1, 1, 128>}]} {
    %c0 = arith.constant 0 : index
    %c0_0 = arith.constant 0 : index
    %0 = vector.load %arg1[%c0, %c0_0] : memref<8x16xf32, #tpu.memory_space<vmem>>, vector<8x16xf32>
    %c0_1 = arith.constant 0 : index
    %c0_2 = arith.constant 0 : index
    %1 = vector.load %arg2[%c0_1, %c0_2] : memref<8x1xi32, #tpu.memory_space<vmem>>, vector<8x1xi32>
    %c0_3 = arith.constant 0 : index
    %c0_4 = arith.constant 0 : index
    %2 = vector.load %arg3[%c0_3, %c0_4] : memref<8x1xf32, #tpu.memory_space<vmem>>, vector<8x1xf32>
    %cst = arith.constant dense<0xFF800000> : vector<8xf32>
    %3 = vector.multi_reduction <maximumf>, %0, %cst [1] : vector<8x16xf32> to vector<8xf32>
    %4 = vector.shape_cast %3 : vector<8xf32> to vector<8x1xf32>
    %5 = vector.broadcast %4 : vector<8x1xf32> to vector<8x16xf32>
    %6 = arith.subf %0, %5 : vector<8x16xf32>
    %7 = math.exp %6 : vector<8x16xf32>
    %cst_5 = arith.constant dense<0.000000e+00> : vector<8xf32>
    %8 = vector.multi_reduction <add>, %7, %cst_5 [1] : vector<8x16xf32> to vector<8xf32>
    %9 = vector.shape_cast %8 : vector<8xf32> to vector<8x1xf32>
    %10 = math.log %9 : vector<8x1xf32>
    %11 = arith.addf %4, %10 : vector<8x1xf32>
    %12 = tpu.iota {dimensions = array<i32: 1>} : vector<8x16xi32>
    %13 = vector.broadcast %1 : vector<8x1xi32> to vector<8x16xi32>
    %14 = arith.cmpi eq, %12, %13 : vector<8x16xi32>
    %cst_6 = arith.constant 0.000000e+00 : f32
    %15 = vector.broadcast %cst_6 : f32 to vector<8x16xf32>
    %16 = arith.select %14, %0, %15 : vector<8x16xi1>, vector<8x16xf32>
    %cst_7 = arith.constant dense<0.000000e+00> : vector<8xf32>
    %17 = vector.multi_reduction <add>, %16, %cst_7 [1] : vector<8x16xf32> to vector<8xf32>
    %18 = vector.shape_cast %17 : vector<8xf32> to vector<8x1xf32>
    %19 = tpu.iota {dimensions = array<i32: 0>} : vector<8x1xi32>
    %c8_i32 = arith.constant 8 : i32
    %20 = arith.muli %arg0, %c8_i32 : i32
    %21 = vector.broadcast %20 : i32 to vector<8x1xi32>
    %22 = arith.addi %21, %19 : vector<8x1xi32>
    %c8_i32_8 = arith.constant 8 : i32
    %23 = vector.broadcast %c8_i32_8 : i32 to vector<8x1xi32>
    %24 = arith.cmpi slt, %22, %23 : vector<8x1xi32>
    %25 = arith.subf %11, %18 : vector<8x1xf32>
    %26 = arith.mulf %2, %25 : vector<8x1xf32>
    %cst_9 = arith.constant 0.000000e+00 : f32
    %27 = vector.broadcast %cst_9 : f32 to vector<8x1xf32>
    %28 = arith.select %24, %26, %27 : vector<8x1xi1>, vector<8x1xf32>
    %29 = vector.shape_cast %28 : vector<8x1xf32> to vector<1x8x1xf32>
    %cst_10 = arith.constant dense<0.000000e+00> : vector<1xf32>
    %30 = vector.multi_reduction <add>, %29, %cst_10 [1, 2] : vector<1x8x1xf32> to vector<1xf32>
    %31 = vector.shape_cast %30 : vector<1xf32> to vector<1x1x1xf32>
    %32 = vector.extract %31[0, 0, 0] : f32 from vector<1x1x1xf32>
    %33 = vector.broadcast %32 : f32 to vector<1x1x128xf32>
    %c0_11 = arith.constant 0 : index
    %c0_12 = arith.constant 0 : index
    %c0_13 = arith.constant 0 : index
    %34 = vector.load %arg4[%c0_11, %c0_12, %c0_13] : memref<1x1x128xf32, #tpu.memory_space<vmem>>, vector<1x1x128xf32>
    tpu.vector_store %arg4[%c0_11, %c0_12, %c0_13], %33 {strides = array<i32>} : memref<1x1x128xf32, #tpu.memory_space<vmem>>, vector<1x1x128xf32>,
    return
  }
  func.func @transform_0(%arg0: i32) -> (i32, i32) {
    %c0_i32 = arith.constant 0 : i32
    %c0_i32_0 = arith.constant 0 : i32
    return %arg0, %c0_i32 : i32, i32
  }
  func.func @transform_1(%arg0: i32) -> (i32, i32) {
    %c0_i32 = arith.constant 0 : i32
    %c0_i32_0 = arith.constant 0 : i32
    return %arg0, %c0_i32 : i32, i32
  }
  func.func @transform_2(%arg0: i32) -> (i32, i32) {
    %c0_i32 = arith.constant 0 : i32
    %c0_i32_0 = arith.constant 0 : i32
    return %arg0, %c0_i32 : i32, i32
  }
  func.func @transform_3(%arg0: i32) -> (i32, i32, i32) {
    %c0_i32 = arith.constant 0 : i32
    %c0_i32_0 = arith.constant 0 : i32
    %c0_i32_1 = arith.constant 0 : i32
    return %arg0, %c0_i32, %c0_i32_0 : i32, i32, i32
  }
}

</mosaic_0001>

<bundles_post_ra>
// kernel: tpu_custom_call.1
= control target key start
LH: loop header
LB: loop body
LE: loop exit
PB: predicated region body
PF: predicated region fallthrough
CT: control target
= control target key end

     0   :  { %vm18_vm0 = vcmask 130048   ;;  %s151_s0 = inlined_call_operand.vmem [shape: f32[8,16], index: 0, kind: input, shape index: {}]   ;;  %s152_s1 = inlined_call_operand.vmem [shape: s32[8,1], index: 1, kind: input, shape index: {}]   ;;  %s153_s2 = inlined_call_operand.vmem [shape: f32[8,1], index: 2, kind: input, shape index: {}]   ;;  %s154_s3 = inlined_call_operand.hbm [shape: f32[1,1,128], index: 3, kind: output, shape index: {}]  }
   0x1   :  { %v15_v0 = vld [vmem:[%s151_s0] sm:$0xff] }
   0x2   :  { %8 = vsyncpa [#allocation3], 0  ;;  %v19_v1 = vsel %vm18_vm0, %v15_v0, -inf  ;;  %v114_v2 = vmov 0   ;;  %v16_v3 = vld [vmem:[%s152_s1] sm:$0xff]  ;;  %v31_v9 = vlaneseq  ;;  %vm50_vm2 = vcmask 7168  }
   0x3   :  { %83 = vset.pattern.permute.xlu0 %v114_v2  ;;  %v17_v19 = vld [vmem:[%s153_s2] sm:$0xff]  ;;  %s115_s16 = smov [#allocation2]   ;;  %s70_s20 = sshll.u32 %s154_s3, 4  ;;  %s71_s20 = int_to_ptr.hbm [resolvable:$true] %s70_s20 }
   0x4   :  { %20 = vmax.xlane.f32.xlu0 %v19_v1  ;;  %v32_v10 = vand.u32 127, %v31_v9  ;;  %s68_s17 = sshll.u32 %s115_s16, 4  ;;  %s69_s17 = int_to_ptr.vmem [resolvable:$true] %s68_s17 }
  0x18   :  { %34 = vperm.xlu0 %83, %v16_v3  }
  0x77   :  { %v21_v4 = vpop.xlane.xlu0 %20 }
  0x78   :  { %v22_v5 = vsub.f32 %v15_v0, %v21_v4 }
  0x7a   :  { %v23_v6 = vmul.f32 1.442695, %v22_v5 }
  0x7c   :  { %84 = vpow2.f32 %v23_v6 }
  0x82   :  { %v85_v7 = vpop.eup %84 }
  0x83   :  { %v25_v8 = vsel %vm18_vm0, %v85_v7, 0.0 }
  0x84   :  { %26 = vadd.xlane.f32.xlu1 %v25_v8 }
  0x8a   :  { %v35_v11 = vpop.permute.xlu0 %34 }
  0x8b   :  { %vm36_vm1 = vcmp.eq.s32.totalorder %v32_v10, %v35_v11 }
  0x8c   :  { %v37_v12 = vsel %vm36_vm1, %v15_v0, 0.0 }
  0x8d   :  { %v38_v13 = vsel %vm18_vm0, %v37_v12, 0.0 }
  0x8e   :  { %39 = vadd.xlane.f32.xlu1 %v38_v13 }
  0xf7   :  { %v27_v14 = vpop.xlane.xlu1 %26 }
  0xf8   :  { %86 = vlog2.f32 %v27_v14 }
  0xfe   :  { %v87_v15 = vpop.eup %86 }
  0xff   :  { %v29_v16 = vmul.f32 0.6931472, %v87_v15 }
 0x101   :  { %v30_v17 = vadd.f32 %v29_v16, %v21_v4  ;;  %v40_v18 = vpop.xlane.xlu1 %39 }
 0x103   :  { %v47_v20 = vsub.f32 %v30_v17, %v40_v18 }
 0x105   :  { %v48_v21 = vmul.f32 %v47_v20, %v17_v19 }
 0x107   :  { %v51_v22 = vsel %vm50_vm2, %v48_v21, 0.0 }
 0x108   :  { %52 = vadd.xlane.f32.xlu2 %v51_v22 }
 0x17b   :  { %v53_v23 = vpop.xlane.xlu2 %52 }
 0x17c   :  { %v54_v24 = vrot.slane %v53_v23, 4 }
 0x17e   :  { %v55_v25 = vadd.f32 %v54_v24, %v53_v23 }
 0x180   :  { %v56_v26 = vrot.slane %v55_v25, 2 }
 0x182   :  { %v57_v27 = vadd.f32 %v56_v26, %v55_v25 }
 0x184   :  { %v58_v28 = vrot.slane %v57_v27, 1 }
 0x186   :  { %v59_v29 = vadd.f32 %v58_v28, %v57_v27 }
 0x188   :  { %79 = vpush %v59_v29 }
 0x1b9   :  { %s80_s2 = spop %79 }
 0x1ba   :  { %v61_v30 = vstv %s80_s2 }
 0x1bb   :  { %62 = vst [vmem:[#allocation2] sm:$0x1] %v61_v30 }
 0x1bc   :  { %73 = dma.vmem_to_hbm [thread:$0]  %s69_s17, 16, %s71_s20, [#allocation3]  }
 0x1bd   :  { %112 = dma.done.wait [#allocation3], 16  }
 0x1be   :  { %113 = vsyncadd [#allocation3], 4294967280 }
 0x1bf   :  { %78 = vsyncpa [#allocation3], 1 }

</bundles_post_ra>
